<compile_context>
chip_gen: v7x
topology: tpu7x:2x2x1
jax: 0.10.0
libtpu: 0.0.40
codegen_flags: <defaults>
</compile_context>

<pallas_src>
import jax
import jax.numpy as jnp
from jax import lax
from jax.experimental import pallas as pl
from jax.experimental.pallas import tpu as pltpu

D_IN, D_OUT = 2, 2
LANES = 128
SUBLANES = 8                      # f32 sublane tile
ROW_PAD_UNIT = SUBLANES * LANES   # pad the flat view to whole (8, 128) tiles
TARGET_BLOCK_ROWS = 2048          # 2048 lane-rows = 128K batch rows = 1 MiB f32 per tile


def _transition_kernel(params_ref, x_ref, o_ref):
    """Linear(2, 2) on a lane-dense interleaved tile.

    params_ref : SMEM (6,) f32 = [W00, W01, W10, W11, b0, b1]  (PyTorch W[out, in])
    x_ref/o_ref: VMEM (block_rows, 128) -- flat (B, 2) viewed as 64 interleaved
                 (z0, z1) pairs per 128-lane row.
    """
    w00 = params_ref[0]
    w01 = params_ref[1]
    w10 = params_ref[2]
    w11 = params_ref[3]
    b0 = params_ref[4]
    b1 = params_ref[5]

    # M = blockdiag_64(W^T): (128, 128) with the 2x2 W^T repeated along the
    # pair diagonal, built from the 6 SMEM scalars (a few VPU ops on 16 vregs
    # per grid step).  Deliberately NOT hoisted into a pl.when(step == 0)
    # scratch: under dimension_semantics=("parallel",) the second v7x
    # TensorCore never executes grid step 0, so such an init would be unsafe.
    r = lax.broadcasted_iota(jnp.int32, (LANES, LANES), 0)   # input-feature lane
    c = lax.broadcasted_iota(jnp.int32, (LANES, LANES), 1)   # output-feature lane
    same_pair = (r >> 1) == (c >> 1)
    r_is_in0 = (r & 1) == 0
    c_is_out0 = (c & 1) == 0
    w_for_in0 = jnp.where(c_is_out0, w00, w10)
    w_for_in1 = jnp.where(c_is_out0, w01, w11)
    m = jnp.where(same_pair,
                  jnp.where(r_is_in0, w_for_in0, w_for_in1),
                  jnp.float32(0.0))

    lane = lax.broadcasted_iota(jnp.int32, (1, LANES), 1)
    bias_lane = jnp.where((lane & 1) == 0, b0, b1)           # (1, 128): b0, b1, b0, ...

    # 64 independent 2x2 GEMMs as one (rows, 128) @ (128, 128) MXU matmul; the
    # MXU time is hidden under the tile's HBM DMA, so the kernel stays HBM-bound.
    # NOTE: for bf16 activations on v6e/v7x one could keep the math in bf16; the
    # f32 path is kept for v5e compatibility and exactness (demo inputs are f32).
    x = x_ref[...].astype(jnp.float32)
    out = jnp.dot(x, m, preferred_element_type=jnp.float32) + bias_lane
    o_ref[...] = out.astype(o_ref.dtype)


def _choose_block_rows(rows: int, target: int = TARGET_BLOCK_ROWS) -> int:
    """Lane-rows per grid step: large tiles for HBM roofline, a multiple of 8
    sublanes, and >= 2 grid steps whenever possible (v7x has 2 TensorCores)."""
    if rows <= SUBLANES:
        return rows                                   # single full-dim block
    half = -(-rows // 2)                              # ensure >= 2 grid steps
    br = min(target, half)
    br = -(-br // SUBLANES) * SUBLANES                # round up to sublane multiple
    return min(br, rows)


def transition_forward(z, weight, bias):
    """z: (B, 2), weight: (2, 2) PyTorch [out, in] layout, bias: (2,) -> (B, 2)."""
    B, d_in = z.shape
    assert d_in == D_IN and weight.shape == (D_OUT, D_IN) and bias.shape == (D_OUT,)

    # Params stay f32 regardless of activation dtype and enter the kernel as 6
    # SMEM scalars -- no tiny (8,128)-padded VMEM constants, no per-step DMAs.
    params = jnp.concatenate(
        [weight.astype(jnp.float32).reshape(-1),
         bias.astype(jnp.float32).reshape(-1)]
    )  # (6,) = [W00, W01, W10, W11, b0, b1]

    # Lane-dense view: row-major (B, 2) == interleaved flat (2B,), so this
    # reshape is copy-free (no transpose).
    n = B * D_IN
    pad = (-n) % ROW_PAD_UNIT
    z_flat = z.reshape(n)
    if pad:
        # Only batches with (2*B) % 1024 != 0 pay this small pad + final slice;
        # aligned batches take the copy-free path.
        z_flat = jnp.pad(z_flat, (0, pad))
    n_padded = n + pad
    rows = n_padded // LANES
    x2d = z_flat.reshape(rows, LANES)

    block_rows = _choose_block_rows(rows)
    grid = (pl.cdiv(rows, block_rows),)   # ragged last block handled by Pallas

    out2d = pl.pallas_call(
        _transition_kernel,
        out_shape=jax.ShapeDtypeStruct((rows, LANES), z.dtype),
        grid=grid,
        in_specs=[
            pl.BlockSpec(memory_space=pltpu.MemorySpace.SMEM),     # 6 scalar params
            pl.BlockSpec((block_rows, LANES), lambda i: (i, 0)),   # lane-dense input tile
        ],
        out_specs=pl.BlockSpec((block_rows, LANES), lambda i: (i, 0)),
        compiler_params=pltpu.CompilerParams(
            dimension_semantics=("parallel",),
        ),
    )(params, x2d)

    out_flat = out2d.reshape(n_padded)
    if pad:
        out_flat = out_flat[:n]
    return out_flat.reshape(B, D_OUT)


def _reference(z, weight, bias):
    return z @ weight.T + bias


if __name__ == "__main__":
    key = jax.random.PRNGKey(0)
    kw, kb, k1, k2, k3 = jax.random.split(key, 5)

    # Deterministic parameters, same shapes / init bound as nn.Linear(2, 2).
    # All test values are rounded to bf16-representable numbers so the numeric
    # check is exact regardless of the MXU's f32-emulation pass count.
    bound = 1.0 / (D_IN ** 0.5)
    weight = jax.random.uniform(kw, (D_OUT, D_IN), jnp.float32, -bound, bound)
    weight = weight.astype(jnp.bfloat16).astype(jnp.float32)
    bias = jax.random.uniform(kb, (D_OUT,), jnp.float32, -bound, bound)
    bias = bias.astype(jnp.bfloat16).astype(jnp.float32)

    checks = [
        ("tiny batch (pad path, single block)", 2, k1),
        ("aligned batch (no pad, 2 grid steps)", 4096, k2),
        ("unaligned batch (pad + ragged last block)", 2052, k3),
    ]
    for name, b, kz in checks:
        z = jax.random.normal(kz, (b, D_IN), jnp.float32)
        z = z.astype(jnp.bfloat16).astype(jnp.float32)
        out = transition_forward(z, weight, bias)
        jax.block_until_ready(out)
        ref = _reference(z, weight, bias)
        assert out.shape == (b, D_OUT), name
        assert jnp.allclose(out, ref, atol=1e-5, rtol=1e-5), name

    print("KERNEL_OK")
</pallas_src>

<mosaic_0001>
module attributes {stable_mosaic.version = 11 : i64} {
  func.func @_transition_kernel(%arg0: i32, %arg1: memref<6xf32, #tpu.memory_space<smem>>, %arg2: memref<8x128xf32, #tpu.memory_space<vmem>>, %arg3: memref<8x128xf32, #tpu.memory_space<vmem>>) attributes {dimension_semantics = [#tpu.dimension_semantics<parallel>], iteration_bounds = array<i64: 1>, scalar_prefetch = 0 : i64, scratch_operands = 0 : i64, tpu.core_type = #tpu.core_type<tc>, window_params = [{transform_indices = @transform_0, window_bounds = array<i64: 6>}, {transform_indices = @transform_1, window_bounds = array<i64: 8, 128>}, {transform_indices = @transform_2, window_bounds = array<i64: 8, 128>}]} {
    %c0 = arith.constant 0 : index
    %0 = memref.load %arg1[%c0] : memref<6xf32, #tpu.memory_space<smem>>
    %c1 = arith.constant 1 : index
    %1 = memref.load %arg1[%c1] : memref<6xf32, #tpu.memory_space<smem>>
    %c2 = arith.constant 2 : index
    %2 = memref.load %arg1[%c2] : memref<6xf32, #tpu.memory_space<smem>>
    %c3 = arith.constant 3 : index
    %3 = memref.load %arg1[%c3] : memref<6xf32, #tpu.memory_space<smem>>
    %c4 = arith.constant 4 : index
    %4 = memref.load %arg1[%c4] : memref<6xf32, #tpu.memory_space<smem>>
    %c5 = arith.constant 5 : index
    %5 = memref.load %arg1[%c5] : memref<6xf32, #tpu.memory_space<smem>>
    %6 = tpu.iota {dimensions = array<i32: 0>} : vector<128x128xi32>
    %7 = tpu.iota {dimensions = array<i32: 1>} : vector<128x128xi32>
    %c1_i32 = arith.constant 1 : i32
    %8 = vector.broadcast %c1_i32 : i32 to vector<128x128xi32>
    %9 = arith.shrsi %6, %8 : vector<128x128xi32>
    %c1_i32_0 = arith.constant 1 : i32
    %10 = vector.broadcast %c1_i32_0 : i32 to vector<128x128xi32>
    %11 = arith.shrsi %7, %10 : vector<128x128xi32>
    %12 = arith.cmpi eq, %9, %11 : vector<128x128xi32>
    %c1_i32_1 = arith.constant 1 : i32
    %13 = vector.broadcast %c1_i32_1 : i32 to vector<128x128xi32>
    %14 = arith.andi %6, %13 : vector<128x128xi32>
    %c0_i32 = arith.constant 0 : i32
    %15 = vector.broadcast %c0_i32 : i32 to vector<128x128xi32>
    %16 = arith.cmpi eq, %14, %15 : vector<128x128xi32>
    %c1_i32_2 = arith.constant 1 : i32
    %17 = vector.broadcast %c1_i32_2 : i32 to vector<128x128xi32>
    %18 = arith.andi %7, %17 : vector<128x128xi32>
    %c0_i32_3 = arith.constant 0 : i32
    %19 = vector.broadcast %c0_i32_3 : i32 to vector<128x128xi32>
    %20 = arith.cmpi eq, %18, %19 : vector<128x128xi32>
    %21 = vector.broadcast %0 : f32 to vector<128x128xf32>
    %22 = vector.broadcast %2 : f32 to vector<128x128xf32>
    %23 = arith.select %20, %21, %22 : vector<128x128xi1>, vector<128x128xf32>
    %24 = vector.broadcast %1 : f32 to vector<128x128xf32>
    %25 = vector.broadcast %3 : f32 to vector<128x128xf32>
    %26 = arith.select %20, %24, %25 : vector<128x128xi1>, vector<128x128xf32>
    %27 = arith.select %16, %23, %26 : vector<128x128xi1>, vector<128x128xf32>
    %cst = arith.constant 0.000000e+00 : f32
    %28 = vector.broadcast %cst : f32 to vector<128x128xf32>
    %29 = arith.select %12, %27, %28 : vector<128x128xi1>, vector<128x128xf32>
    %30 = tpu.iota {dimensions = array<i32: 1>} : vector<1x128xi32>
    %c1_i32_4 = arith.constant 1 : i32
    %31 = vector.broadcast %c1_i32_4 : i32 to vector<1x128xi32>
    %32 = arith.andi %30, %31 : vector<1x128xi32>
    %c0_i32_5 = arith.constant 0 : i32
    %33 = vector.broadcast %c0_i32_5 : i32 to vector<1x128xi32>
    %34 = arith.cmpi eq, %32, %33 : vector<1x128xi32>
    %35 = vector.broadcast %4 : f32 to vector<1x128xf32>
    %36 = vector.broadcast %5 : f32 to vector<1x128xf32>
    %37 = arith.select %34, %35, %36 : vector<1x128xi1>, vector<1x128xf32>
    %c0_6 = arith.constant 0 : index
    %c0_7 = arith.constant 0 : index
    %38 = vector.load %arg2[%c0_6, %c0_7] : memref<8x128xf32, #tpu.memory_space<vmem>>, vector<8x128xf32>
    %cst_8 = arith.constant dense<0.000000e+00> : vector<8x128xf32>
    %39 = tpu.matmul %38, %29, %cst_8 {dimension_numbers = #tpu.dot_dimension_numbers<[1], [0], [0], [1], [0, 0, 1, 1], [], []>} : vector<8x128xf32>, vector<128x128xf32>, vector<8x128xf32> -> vector<8x128xf32>
    %40 = vector.broadcast %37 : vector<1x128xf32> to vector<8x128xf32>
    %41 = arith.addf %39, %40 : vector<8x128xf32>
    %c0_9 = arith.constant 0 : index
    %c0_10 = arith.constant 0 : index
    %42 = vector.load %arg3[%c0_9, %c0_10] : memref<8x128xf32, #tpu.memory_space<vmem>>, vector<8x128xf32>
    tpu.vector_store %arg3[%c0_9, %c0_10], %41 {strides = array<i32>} : memref<8x128xf32, #tpu.memory_space<vmem>>, vector<8x128xf32>,
    return
  }
  func.func @transform_0(%arg0: i32) -> i32 {
    %c0_i32 = arith.constant 0 : i32
    %c0_i32_0 = arith.constant 0 : i32
    return %c0_i32 : i32
  }
  func.func @transform_1(%arg0: i32) -> (i32, i32) {
    %c0_i32 = arith.constant 0 : i32
    %c0_i32_0 = arith.constant 0 : i32
    return %arg0, %c0_i32 : i32, i32
  }
  func.func @transform_2(%arg0: i32) -> (i32, i32) {
    %c0_i32 = arith.constant 0 : i32
    %c0_i32_0 = arith.constant 0 : i32
    return %arg0, %c0_i32 : i32, i32
  }
}

</mosaic_0001>

<bundles_post_ra>
// kernel: tpu_custom_call.1
= control target key start
LH: loop header
LB: loop body
LE: loop exit
PB: predicated region body
PF: predicated region fallthrough
CT: control target
= control target key end

     0   :  { %7 = vsyncpa [#allocation5], 0  ;;  %s686_s0 = inlined_call_operand.hbm [shape: f32[6], index: 0, kind: input, shape index: {}]   ;;  %s687_s1 = inlined_call_operand.hbm [shape: f32[8,128], index: 1, kind: input, shape index: {}]   ;;  %s688_s2 = inlined_call_operand.hbm [shape: f32[8,128], index: 2, kind: output, shape index: {}]  }
   0x1   :  { %8 = vsyncpa [#allocation3], 0 }
   0x2   :  { %9 = vsyncpa [#allocation4], 0  ;;  %s367_s11 = scalar_lea.hbm %s686_s0, 16 }
   0x3   :  { %p368_p0 = scmp.ne.s32.totalorder %s686_s0, %s367_s11  ;;  %p371_p1 = scmp.lt.u32.totalorder %s367_s11, %s686_s0 }
   0x5   :  { %p373_p2 = pnand %p371_p1, %p368_p0 }
   0x7   :  { %376 = shalt.err (!%p373_p2)
}
   0x8   :  { %s427_s16 = smov [#allocation2]   ;;  %s428_s19 = smov [#allocation6]  }
   0x9   :  { %17 = dma.hbm_to_smem %s686_s0, 16, %s427_s16, [#allocation5]  }
   0xa   :  { %s24_s20 = sshll.u32 %s428_s19, 4  ;;  %s377_s23 = scalar_lea.hbm %s687_s1, 128  ;;  %s25_s20 = int_to_ptr.vmem [resolvable:$true] %s24_s20 }
   0xb   :  { %p378_p3 = scmp.ne.s32.totalorder %s687_s1, %s377_s23  ;;  %p381_p4 = scmp.lt.u32.totalorder %s377_s23, %s687_s1 }
   0xd   :  { %p383_p5 = pnand %p381_p4, %p378_p3 }
   0xf   :  { %386 = shalt.err (!%p383_p5)
}
  0x10   :  { %s387_s28 = scalar_lea.vmem %s25_s20, 128  ;;  %p392_p7 = scmp.lt.s32.totalorder %s25_s20, %s25_s20 }
  0x11   :  { %p388_p6 = scmp.ne.s32.totalorder %s25_s20, %s387_s28  ;;  %p393_p8 = scmp.lt.s32.totalorder %s387_s28, %s387_s28 }
  0x13   :  { %p394_p9 = por %p393_p8, %p392_p7 }
  0x15   :  { %p395_p10 = pnand %p394_p9, %p388_p6 }
  0x17   :  { %398 = shalt.err (!%p395_p10)
}
  0x18   :  { %27 = dma.hbm_to_vmem [thread:$0]  %s687_s1, 128, %s25_s20, [#allocation3]  }
  0x19   :  { %421 = dma.done.wait [#allocation5], 16  }
  0x1a   :  { %422 = vsyncadd [#allocation5], 4294967280 }
  0x1b   :  { %423 = dma.done.wait [#allocation3], 128  }
  0x1c   :  { %424 = vsyncadd [#allocation3], 4294967168 }
  0x1d   :  { %34 = sfence }
  0x1e   :  { %s35_s30 = sld [smem:[#allocation2]]  ;;  %s472_s3 = sld [smem:[#allocation2 + $0x1]]  ;;  %v41_v0 = vlaneseq  ;;  %v429_v1 = vmov 0.0|0.0   ;;  %vm430_vm0 = vmmov 0   ;;  %v431_v4 = vmov 0.0   ;;  %v168_v44 = vld [vmem:[#allocation6] sm:$0xff] }
  0x1f   :  { %329 = vmatprep.subr.bf16.mxu0 %v429_v1  ;;  %s257_s4 = sld [smem:[#allocation2 + $0x2]]  ;;  %s258_s5 = sld [smem:[#allocation2 + $0x3]]  ;;  %326 = vmatprep.mubr.msk.f32.mxu0 %vm430_vm0, %v431_v4 }
  0x20   :  { %v475_v2 = vshrl.u32 %v41_v0, 7  ;;  %v59_v3 = vand.u32 127, %v41_v0  ;;  %s259_s1 = sld [smem:[#allocation2 + $0x4]]  ;;  %s260_s6 = sld [smem:[#allocation2 + $0x5]] }
  0x21   :  { %s432_s7 = smov [#allocation7]  }
  0x22   :  { %v43_v5 = vadd.s32 8, %v475_v2  ;;  %v60_v6 = vshra.s32 %v475_v2, 1  ;;  %v479_v7 = vshra.s32 %v59_v3, 1  ;;  %v93_v8 = vand.u32 1, %v475_v2  ;;  %s246_s8 = sshll.u32 %s432_s7, 4  ;;  %s247_s8 = int_to_ptr.vmem [resolvable:$true] %s246_s8 }
  0x23   :  { %v125_v9 = vand.u32 1, %v59_v3  ;;  %v44_v10 = vadd.s32 16, %v475_v2  ;;  %v45_v11 = vadd.s32 24, %v475_v2  ;;  %v46_v12 = vadd.s32 32, %v475_v2  ;;  %s399_s9 = scalar_lea.vmem %s247_s8, 128  ;;  %p404_p12 = scmp.lt.s32.totalorder %s247_s8, %s247_s8 }
  0x24   :  { %v61_v13 = vshra.s32 %v43_v5, 1  ;;  %vm486_vm1 = vcmp.eq.s32.totalorder %v60_v6, %v479_v7  ;;  %v94_v15 = vand.u32 1, %v43_v5  ;;  %vm490_vm2 = vcmp.eq.s32.totalorder %v93_v8, 0  ;;  %p400_p11 = scmp.ne.s32.totalorder %s247_s8, %s399_s9  ;;  %p405_p13 = scmp.lt.s32.totalorder %s399_s9, %s399_s9 }
  0x25   :  { %vm494_vm3 = vcmp.eq.s32.totalorder %v125_v9, 0  ;;  %v127_v18 = vstv %s35_s30  ;;  %v128_v19 = vstv %s257_s4  ;;  %v130_v20 = vstv %s472_s3 }
  0x26   :  { %vm500_vm4 = vcmp.eq.s32.totalorder %v61_v13, %v479_v7  ;;  %vm110_vm5 = vcmp.eq.s32.totalorder %v94_v15, 0  ;;  %v506_v22 = vsel %vm494_vm3, %v127_v18, %v128_v19  ;;  %v131_v23 = vstv %s258_s5  ;;  %p406_p0 = por %p405_p13, %p404_p12 }
  0x27   :  { %v510_v24 = vsel %vm494_vm3, %v130_v20, %v131_v23  ;;  %v62_v25 = vshra.s32 %v44_v10, 1  ;;  %v63_v26 = vshra.s32 %v45_v11, 1  ;;  %v95_v27 = vand.u32 1, %v44_v10  ;;  %vm331_vm6 = vmpackc.low %vm500_vm4, %vm486_vm1 }
  0x28   :  { %v133_v28 = vsel %vm490_vm2, %v506_v22, %v510_v24  ;;  %v134_v29 = vsel %vm110_vm5, %v506_v22, %v510_v24  ;;  %v96_v30 = vand.u32 1, %v45_v11  ;;  %v47_v31 = vadd.s32 40, %v475_v2  ;;  %p407_p1 = pnand %p406_p0, %p400_p11 }
  0x29   :  { %v330_v32 = vpack.c.bf16 %v134_v29, %v133_v28  ;;  %vm524_vm7 = vcmp.eq.s32.totalorder %v62_v25, %v479_v7  ;;  %vm529_vm8 = vcmp.eq.s32.totalorder %v63_v26, %v479_v7  ;;  %vm111_vm9 = vcmp.eq.s32.totalorder %v95_v27, 0 }
  0x2a   :  { %vm112_vm10 = vcmp.eq.s32.totalorder %v96_v30, 0  ;;  %v135_v35 = vsel %vm111_vm9, %v506_v22, %v510_v24  ;;  %v64_v36 = vshra.s32 %v46_v12, 1  ;;  %v65_v37 = vshra.s32 %v47_v31, 1  ;;  %vm335_vm11 = vmpackc.low %vm529_vm8, %vm524_vm7 }
  0x2b   :  { %332 = vmatpush3.bf16.msk.msra.mxu0 %vm331_vm6, %v330_v32  ;;  %v136_v38 = vsel %vm112_vm10, %v506_v22, %v510_v24  ;;  %v97_v39 = vand.u32 1, %v46_v12  ;;  %v98_v40 = vand.u32 1, %v47_v31  ;;  %v48_v41 = vadd.s32 48, %v475_v2 }
  0x2c   :  { %333 = vmatprep.subr.bf16.mxu0 %v429_v1  ;;  %v334_v42 = vpack.c.bf16 %v136_v38, %v135_v35  ;;  %vm544_vm12 = vcmp.eq.s32.totalorder %v64_v36, %v479_v7  ;;  %vm549_vm13 = vcmp.eq.s32.totalorder %v65_v37, %v479_v7  ;;  %v49_v45 = vadd.s32 56, %v475_v2 }
  0x2d   :  { %vm113_vm14 = vcmp.eq.s32.totalorder %v97_v39, 0  ;;  %vm114_vm15 = vcmp.eq.s32.totalorder %v98_v40, 0  ;;  %v66_v46 = vshra.s32 %v48_v41, 1  ;;  %v99_v47 = vand.u32 1, %v48_v41  ;;  %vm339_vm2 = vmpackc.low %vm549_vm13, %vm544_vm12 }
  0x2e   :  { %v137_v48 = vsel %vm113_vm14, %v506_v22, %v510_v24  ;;  %v138_v49 = vsel %vm114_vm15, %v506_v22, %v510_v24  ;;  %v67_v50 = vshra.s32 %v49_v45, 1  ;;  %v100_v51 = vand.u32 1, %v49_v45 }
  0x2f   :  { %336 = vmatpush3.bf16.msk.msra.mxu0 %vm335_vm11, %v334_v42  ;;  %v338_v52 = vpack.c.bf16 %v138_v49, %v137_v48  ;;  %vm559_vm0 = vcmp.eq.s32.totalorder %v66_v46, %v479_v7  ;;  %vm563_vm1 = vcmp.eq.s32.totalorder %v99_v47, 0  ;;  %v50_v55 = vadd.s32 64, %v475_v2 }
  0x30   :  { %337 = vmatprep.subr.bf16.mxu0 %v429_v1  ;;  %vm574_vm4 = vcmp.eq.s32.totalorder %v67_v50, %v479_v7  ;;  %vm116_vm5 = vcmp.eq.s32.totalorder %v100_v51, 0  ;;  %v139_v57 = vsel %vm563_vm1, %v506_v22, %v510_v24  ;;  %v51_v58 = vadd.s32 72, %v475_v2 }
  0x31   :  { %v140_v59 = vsel %vm116_vm5, %v506_v22, %v510_v24  ;;  %v68_v60 = vshra.s32 %v50_v55, 1  ;;  %v101_v61 = vand.u32 1, %v50_v55  ;;  %v52_v62 = vadd.s32 80, %v475_v2  ;;  %vm343_vm7 = vmpackc.low %vm574_vm4, %vm559_vm0 }
  0x32   :  { %v69_v63 = vshra.s32 %v51_v58, 1  ;;  %v102_v0 = vand.u32 1, %v51_v58  ;;  %v53_v3 = vadd.s32 88, %v475_v2  ;;  %v342_v4 = vpack.c.bf16 %v140_v59, %v139_v57 }
  0x33   :  { %340 = vmatpush3.bf16.msk.msra.mxu0 %vm339_vm2, %v338_v52  ;;  %vm587_vm6 = vcmp.eq.s32.totalorder %v101_v61, 0  ;;  %v70_v6 = vshra.s32 %v52_v62, 1  ;;  %v103_v8 = vand.u32 1, %v52_v62  ;;  %vm597_vm8 = vcmp.eq.s32.totalorder %v68_v60, %v479_v7 }
  0x34   :  { %341 = vmatprep.subr.bf16.mxu0 %v429_v1  ;;  %vm602_vm9 = vcmp.eq.s32.totalorder %v69_v63, %v479_v7  ;;  %vm118_vm10 = vcmp.eq.s32.totalorder %v102_v0, 0  ;;  %v141_v11 = vsel %vm587_vm6, %v506_v22, %v510_v24  ;;  %v71_v13 = vshra.s32 %v53_v3, 1 }
  0x35   :  { %v142_v12 = vsel %vm118_vm10, %v506_v22, %v510_v24  ;;  %v104_v14 = vand.u32 1, %v53_v3  ;;  %vm612_vm11 = vcmp.eq.s32.totalorder %v103_v8, 0  ;;  %vm617_vm12 = vcmp.eq.s32.totalorder %v70_v6, %v479_v7  ;;  %vm347_vm14 = vmpackc.low %vm602_vm9, %vm597_vm8 }
  0x36   :  { %v54_v18 = vadd.s32 96, %v475_v2  ;;  %v346_v19 = vpack.c.bf16 %v142_v12, %v141_v11  ;;  %v55_v21 = vadd.s32 104, %v475_v2  ;;  %v56_v23 = vadd.s32 112, %v475_v2 }
  0x37   :  { %344 = vmatpush3.bf16.msk.msra.mxu0 %vm343_vm7, %v342_v4  ;;  %vm622_vm13 = vcmp.eq.s32.totalorder %v104_v14, 0  ;;  %v143_v25 = vsel %vm612_vm11, %v506_v22, %v510_v24  ;;  %v57_v28 = vadd.s32 120, %v475_v2  ;;  %vm643_vm15 = vcmp.eq.s32.totalorder %v71_v13, %v479_v7 }
  0x38   :  { %345 = vmatprep.subr.bf16.mxu0 %v429_v1  ;;  %v144_v26 = vsel %vm622_vm13, %v506_v22, %v510_v24  ;;  %v105_v27 = vand.u32 1, %v54_v18  ;;  %v72_v30 = vshra.s32 %v54_v18, 1  ;;  %v73_v31 = vshra.s32 %v55_v21, 1  ;;  %vm351_vm2 = vmpackc.low %vm643_vm15, %vm617_vm12 }
  0x39   :  { %v106_v32 = vand.u32 1, %v55_v21  ;;  %v107_v34 = vand.u32 1, %v56_v23  ;;  %v350_v35 = vpack.c.bf16 %v144_v26, %v143_v25  ;;  %v74_v37 = vshra.s32 %v56_v23, 1 }
  0x3a   :  { %vm647_vm0 = vcmp.eq.s32.totalorder %v105_v27, 0  ;;  %v108_v38 = vand.u32 1, %v57_v28  ;;  %vm89_vm4 = vcmp.eq.s32.totalorder %v72_v30, %v479_v7  ;;  %vm90_vm5 = vcmp.eq.s32.totalorder %v73_v31, %v479_v7 }
  0x3b   :  { %348 = vmatpush3.bf16.msk.msra.mxu0 %vm347_vm14, %v346_v19  ;;  %vm122_vm1 = vcmp.eq.s32.totalorder %v106_v32, 0  ;;  %v145_v2 = vsel %vm647_vm0, %v506_v22, %v510_v24  ;;  %v75_v39 = vshra.s32 %v57_v28, 1  ;;  %vm123_vm6 = vcmp.eq.s32.totalorder %v107_v34, 0  ;;  %vm355_vm8 = vmpackc.low %vm90_vm5, %vm89_vm4 }
  0x3c   :  { %349 = vmatprep.subr.bf16.mxu0 %v429_v1  ;;  %v146_v36 = vsel %vm122_vm1, %v506_v22, %v510_v24  ;;  %vm124_vm7 = vcmp.eq.s32.totalorder %v108_v38, 0  ;;  %v147_v41 = vsel %vm123_vm6, %v506_v22, %v510_v24  ;;  %vm91_vm9 = vcmp.eq.s32.totalorder %v74_v37, %v479_v7 }
  0x3d   :  { %v354_v40 = vpack.c.bf16 %v146_v36, %v145_v2  ;;  %v148_v42 = vsel %vm124_vm7, %v506_v22, %v510_v24  ;;  %vm92_vm10 = vcmp.eq.s32.totalorder %v75_v39, %v479_v7  ;;  %v165_v45 = vstv %s259_s1 }
  0x3e   :  { %v358_v43 = vpack.c.bf16 %v148_v42, %v147_v41  ;;  %vm359_vm11 = vmpackc.low %vm92_vm10, %vm91_vm9  ;;  %v166_v46 = vstv %s260_s6 }
  0x3f   :  { %352 = vmatpush3.bf16.msk.msra.mxu0 %vm351_vm2, %v350_v35  ;;  %v167_v47 = vsel %vm494_vm3, %v165_v45, %v166_v46 }
  0x40   :  { %353 = vmatprep.subr.bf16.mxu0 %v429_v1 }
  0x43   :  { %356 = vmatpush3.bf16.msk.msra.mxu0 %vm355_vm8, %v354_v40 }
  0x44   :  { %357 = vmatprep.subr.bf16.mxu0 %v429_v1 }
  0x47   :  { %360 = vmatpush3.bf16.msk.msra.mxu0 %vm359_vm11, %v358_v43 }
  0x4a   :  { %327 = vmatmul.mubr.f32.vlgmr.msra.gmra.mrb[0].mxu0 %v168_v44 }
 0x11d   :  { %v235_v22 = vpop.f32.mrb[0].mxu0 }
 0x11e   :  { %v236_v24 = vadd.f32 %v235_v22, %v167_v47  ;;  %v328_v7 = vpop.f32.mrb[1].mxu0 }
 0x120   :  { %239 = vst [vmem:[#allocation7] sm:$0xff] %v236_v24 }
 0x121   :  { %410 = shalt.err (!%p407_p1)
}
 0x122   :  { %s411_s12 = scalar_lea.hbm %s688_s2, 128 }
 0x123   :  { %p412_p2 = scmp.ne.s32.totalorder %s688_s2, %s411_s12  ;;  %p415_p3 = scmp.lt.u32.totalorder %s411_s12, %s688_s2 }
 0x125   :  { %p417_p4 = pnand %p415_p3, %p412_p2 }
 0x127   :  { %420 = shalt.err (!%p417_p4)
}
 0x128   :  { %249 = dma.vmem_to_hbm [thread:$0]  %s247_s8, 128, %s688_s2, [#allocation4]  }
 0x129   :  { %425 = dma.done.wait [#allocation4], 128  }
 0x12a   :  { %426 = vsyncadd [#allocation4], 4294967168 }
 0x12b   :  { %253 = vsyncpa [#allocation3], 1 }
 0x12c   :  { %254 = vsyncpa [#allocation4], 1 }
 0x12d   :  { %255 = vsyncpa [#allocation5], 1 }

</bundles_post_ra>
